<compile_context>
chip_gen: v5e
topology: v5e:2x2
jax: 0.10.0
libtpu: 0.0.40
codegen_flags: <defaults>
</compile_context>

<pallas_src>
import functools

import jax
import jax.numpy as jnp
from jax.experimental import pallas as pl
from jax.experimental.pallas import tpu as pltpu


# --------------------------------------------------------------------------- #
# Budget / tile selection helpers
# --------------------------------------------------------------------------- #

def _vmem_limit_bytes():
    """Scoped-VMEM request derived from the actual chip (v5e/v6e: 128 MiB,
    v7x: 64 MiB), with ~25% headroom; conservative fallback if unknown."""
    cap = 0
    try:
        cap = int(getattr(pltpu.get_tpu_info(), "vmem_capacity_bytes", 0))
    except Exception:
        cap = 0
    if cap < 32 * 1024 * 1024:
        cap = 64 * 1024 * 1024          # assume the smallest (v7x) if unknown
    return int(min(cap * 3 // 4, 100 * 1024 * 1024))


def _largest_divisor_leq(n, cap):
    cap = max(1, min(n, cap))
    for d in range(cap, 0, -1):
        if n % d == 0:
            return d
    return 1


def _choose_batch_tile(n, c, dtype_bytes, budget_bytes):
    """Divisor of N, <= 8; keeps >= 2 leading grid entries when N >= 2 (v7x
    megacore) and shrinks until a >=512-lane x tile fits the per-tile budget."""
    cap = 8
    if n >= 2:
        cap = min(cap, max(1, n // 2))
    tn = _largest_divisor_leq(n, cap)
    while tn > 1 and tn * c * dtype_bytes * 512 > budget_bytes:
        tn = _largest_divisor_leq(n, tn - 1)
    return tn


def _choose_lane_tile(hw, rows, dtype_bytes, budget_bytes, override=None):
    """Lane (HW) tile: either the full extent (always layout-legal) or a
    multiple of 128 that fits `budget_bytes` for a (rows, tile) block."""
    if override is not None:
        if override >= hw:
            return hw
        assert override % 128 == 0, "hw_tile override must be a multiple of 128"
        return override
    bytes_per_lane = max(rows * dtype_bytes, 1)
    max_lanes = max(128, (budget_bytes // bytes_per_lane) // 128 * 128)
    if hw <= max_lanes:
        return hw                          # single full-extent lane tile
    thw = max_lanes                        # multiple of 128, < hw
    # Prefer an exact multiple-of-128 divisor near thw (avoids the masked tail).
    for cand in range(thw, 127, -128):
        if hw % cand == 0:
            if cand * 2 >= thw:
                thw = cand
            break
    return thw


# --------------------------------------------------------------------------- #
# Kernels
# --------------------------------------------------------------------------- #

def _accumulate_tile(x_ref, acc_ref, k, *, hw_total, lane_tile, masked):
    """Up-cast this x tile to f32 and add its (masked) lane-sum into acc."""
    x = x_ref[...].astype(jnp.float32)                    # (TN, C, THW)
    if masked:                                            # exact tail handling
        lane = jax.lax.broadcasted_iota(jnp.int32, x.shape, x.ndim - 1)
        x = jnp.where(k * lane_tile + lane < hw_total, x, 0.0)
    acc_ref[...] += jnp.sum(x, axis=-1)                   # XLU reduce, (TN, C)


def _pool_mlp_kernel(x_ref, w1_ref, b1_ref, w2_ref, b2_ref, f_ref, acc_ref,
                     *, inv_hw, hw_total, lane_tile, masked):
    """Phase 1 (fused): streamed global-average pool + squeeze/excite MLP.

    x_ref: (TN, C, THW) native dtype; weights f32 (VMEM-resident);
    f_ref: (TN, 1, C) f32 gates; acc_ref: (TN, C) f32 scratch.
    """
    k = pl.program_id(1)

    @pl.when(k == 0)
    def _init():
        acc_ref[...] = jnp.zeros_like(acc_ref)

    _accumulate_tile(x_ref, acc_ref, k,
                     hw_total=hw_total, lane_tile=lane_tile, masked=masked)

    @pl.when(k == pl.num_programs(1) - 1)
    def _finalize():
        pooled = acc_ref[...] * inv_hw                               # (TN, C)
        h = jnp.dot(pooled, w1_ref[...],
                    preferred_element_type=jnp.float32) + b1_ref[...]
        h = jnp.maximum(h, 0.0)                                      # ReLU
        f = jnp.dot(h, w2_ref[...],
                    preferred_element_type=jnp.float32) + b2_ref[...]
        f_ref[...] = jax.nn.sigmoid(f)[:, None, :]                   # (TN,1,C)


def _pool_kernel(x_ref, pooled_ref, acc_ref,
                 *, inv_hw, hw_total, lane_tile, masked):
    """Phase 1 (pool-only variant for very large C): emit pooled means,
    the tiny MLP then runs in plain XLA so no weights ever sit in VMEM."""
    k = pl.program_id(1)

    @pl.when(k == 0)
    def _init():
        acc_ref[...] = jnp.zeros_like(acc_ref)

    _accumulate_tile(x_ref, acc_ref, k,
                     hw_total=hw_total, lane_tile=lane_tile, masked=masked)

    @pl.when(k == pl.num_programs(1) - 1)
    def _finalize():
        pooled_ref[...] = (acc_ref[...] * inv_hw)[:, None, :]        # (TN,1,C)


def _broadcast_kernel(g_ref, o_ref):
    """Phase 2: write-only lane-dense broadcast of per-(n,c) gates.
    g_ref: (TN, C, 1) f32; o_ref: (TN, C, THW) x.dtype."""
    o_ref[...] = jnp.broadcast_to(g_ref[...].astype(o_ref.dtype), o_ref.shape)


def _scale_kernel(x_ref, g_ref, o_ref):
    """Phase 2 (optional fused SE product): out = x * gate, one pass over x."""
    o_ref[...] = (x_ref[...].astype(jnp.float32) *
                  g_ref[...].astype(jnp.float32)).astype(o_ref.dtype)


# --------------------------------------------------------------------------- #
# Wrapper
# --------------------------------------------------------------------------- #

def channelwise_attention(x, w1, b1, w2, b2, *, hw_tile=None, fuse_mlp=None,
                          apply_to_input=False):
    """x: (N, C, H, W) any float dtype (kept on the wire); w1: (C//4, C);
    b1: (C//4,); w2: (C, C//4); b2: (C,)  [PyTorch nn.Linear layout].

    Returns the broadcast channel gates in x.dtype (module semantics).
    `apply_to_input=True` instead returns x * gate fused in the write pass
    (the usual SE consumer pattern), saving a full |x| read+write downstream.
    `hw_tile` (multiple of 128) / `fuse_mlp` override the automatic choices.
    """
    n, c, h, w = x.shape
    c4 = c // 4
    hw = h * w
    dtype = x.dtype
    dtype_bytes = jnp.dtype(dtype).itemsize

    # Free reshape (contiguous dims); NO dtype cast — x stays native on the wire.
    x_flat = x.reshape(n, c, hw)
    w1_k = jnp.transpose(w1).astype(jnp.float32)        # (C, C4)
    w2_k = jnp.transpose(w2).astype(jnp.float32)        # (C4, C)
    b1_k = b1.reshape(1, c4).astype(jnp.float32)
    b2_k = b2.reshape(1, c).astype(jnp.float32)

    vmem_limit = _vmem_limit_bytes()
    budget1 = max(2 * 1024 * 1024, vmem_limit // 6)     # phase-1 x tile budget
    budget2 = max(4 * 1024 * 1024,                      # phase-2 tile budget
                  vmem_limit // (6 if apply_to_input else 3))

    # Fuse the tiny MLP into the pooling kernel unless its resident (double-
    # buffer-counted) weights would eat a meaningful slice of VMEM (large C).
    resident_weight_bytes = 2 * 2 * (c * c4 + c4 + c) * 4
    if fuse_mlp is None:
        fuse_mlp = resident_weight_bytes <= vmem_limit // 8

    # ---------------- Phase 1: pooled mean (+ MLP) -> gates f (N, C) --------
    tn1 = _choose_batch_tile(n, c, dtype_bytes, budget1)
    thw1 = _choose_lane_tile(hw, tn1 * c, dtype_bytes, budget1, hw_tile)
    nk = pl.cdiv(hw, thw1)
    masked = (hw % thw1) != 0
    inv_hw = 1.0 / float(hw)

    compiler1 = pltpu.CompilerParams(
        dimension_semantics=("parallel", "arbitrary"),
        vmem_limit_bytes=vmem_limit)
    x_spec1 = pl.BlockSpec((tn1, c, thw1), lambda i, k: (i, 0, k))
    f_spec1 = pl.BlockSpec((tn1, 1, c), lambda i, k: (i, 0, 0))

    if fuse_mlp:
        f = pl.pallas_call(
            functools.partial(_pool_mlp_kernel, inv_hw=inv_hw, hw_total=hw,
                              lane_tile=thw1, masked=masked),
            out_shape=jax.ShapeDtypeStruct((n, 1, c), jnp.float32),
            grid_spec=pltpu.PrefetchScalarGridSpec(
                num_scalar_prefetch=0,
                grid=(n // tn1, nk),
                in_specs=[
                    x_spec1,
                    pl.BlockSpec((c, c4), lambda i, k: (0, 0)),   # resident
                    pl.BlockSpec((1, c4), lambda i, k: (0, 0)),
                    pl.BlockSpec((c4, c), lambda i, k: (0, 0)),
                    pl.BlockSpec((1, c), lambda i, k: (0, 0)),
                ],
                out_specs=f_spec1,
                scratch_shapes=[pltpu.VMEM((tn1, c), jnp.float32)]),
            compiler_params=compiler1,
        )(x_flat, w1_k, b1_k, w2_k, b2_k)
        f = f.reshape(n, c)
    else:
        pooled = pl.pallas_call(
            functools.partial(_pool_kernel, inv_hw=inv_hw, hw_total=hw,
                              lane_tile=thw1, masked=masked),
            out_shape=jax.ShapeDtypeStruct((n, 1, c), jnp.float32),
            grid_spec=pltpu.PrefetchScalarGridSpec(
                num_scalar_prefetch=0,
                grid=(n // tn1, nk),
                in_specs=[x_spec1],
                out_specs=f_spec1,
                scratch_shapes=[pltpu.VMEM((tn1, c), jnp.float32)]),
            compiler_params=compiler1,
        )(x_flat).reshape(n, c)
        # Tiny (N, C) MLP in plain XLA — negligible vs. streaming |x|.
        h_act = jax.nn.relu(pooled @ w1_k + b1_k)
        f = jax.nn.sigmoid(h_act @ w2_k + b2_k)

    # ---------------- Phase 2: lane-dense broadcast (or fused x * gate) -----
    tn2 = _choose_batch_tile(n, c, dtype_bytes, budget2)
    thw2 = _choose_lane_tile(hw, tn2 * c, dtype_bytes, budget2, hw_tile)
    f3 = f.reshape(n, c, 1)                              # f32, a few KB

    g_spec = pl.BlockSpec((tn2, c, 1), lambda i, j: (i, 0, 0))
    o_spec = pl.BlockSpec((tn2, c, thw2), lambda i, j: (i, 0, j))
    compiler2 = pltpu.CompilerParams(
        dimension_semantics=("parallel", "parallel"),
        vmem_limit_bytes=vmem_limit)
    grid2 = (n // tn2, pl.cdiv(hw, thw2))

    if apply_to_input:
        out_flat = pl.pallas_call(
            _scale_kernel,
            out_shape=jax.ShapeDtypeStruct((n, c, hw), dtype),
            grid_spec=pltpu.PrefetchScalarGridSpec(
                num_scalar_prefetch=0, grid=grid2,
                in_specs=[o_spec, g_spec],               # x tile + gate
                out_specs=o_spec),
            compiler_params=compiler2,
        )(x_flat, f3)
    else:
        out_flat = pl.pallas_call(
            _broadcast_kernel,
            out_shape=jax.ShapeDtypeStruct((n, c, hw), dtype),
            grid_spec=pltpu.PrefetchScalarGridSpec(
                num_scalar_prefetch=0, grid=grid2,
                in_specs=[g_spec],
                out_specs=o_spec),
            compiler_params=compiler2,
        )(f3)

    return out_flat.reshape(n, c, h, w)


# --------------------------------------------------------------------------- #
# Reference + self-test
# --------------------------------------------------------------------------- #

def _reference(x, w1, b1, w2, b2):
    """Pure-JAX (f32) reference mirroring the PyTorch forward."""
    n, c, h, w = x.shape
    xf = x.astype(jnp.float32)
    pooled = jnp.mean(xf, axis=(2, 3))                        # (N, C)
    hdd = jax.nn.relu(pooled @ w1.T + b1)                     # (N, C//4)
    f = jax.nn.sigmoid(hdd @ w2.T + b2)                       # (N, C)
    return jnp.broadcast_to(f[:, :, None, None], (n, c, h, w))
# TODO(synk): ca_act_reg = mean(f) is computed by the PyTorch module but never
# returned, so it is intentionally not produced here.


if __name__ == "__main__":
    # Small shapes consistent with the module: batch=2, channels=4, spatial=16.
    N, C, H, W = 2, 4, 16, 16
    C4 = C // 4

    key = jax.random.PRNGKey(0)
    kx, k1, k2, k3, k4 = jax.random.split(key, 5)

    x = jax.random.normal(kx, (N, C, H, W), dtype=jnp.float32)
    w1 = jax.random.normal(k1, (C4, C), dtype=jnp.float32) * 0.5
    b1 = jax.random.normal(k2, (C4,), dtype=jnp.float32) * 0.1
    w2 = jax.random.normal(k3, (C, C4), dtype=jnp.float32) * 0.5
    b2 = jax.random.normal(k4, (C,), dtype=jnp.float32) * 0.1

    ref = _reference(x, w1, b1, w2, b2)

    # 1) auto tiling (single lane tile, fused MLP), native f32 in/out.
    out = jax.block_until_ready(channelwise_attention(x, w1, b1, w2, b2))
    assert out.shape == (N, C, H, W) and out.dtype == x.dtype
    assert jnp.allclose(out, ref, atol=1e-5, rtol=1e-5), "mismatch (auto tiles)"

    # 2) forced 128-lane tiles: multi-step HW reduction + multi-tile broadcast.
    out_t = jax.block_until_ready(
        channelwise_attention(x, w1, b1, w2, b2, hw_tile=128))
    assert jnp.allclose(out_t, ref, atol=1e-5, rtol=1e-5), "mismatch (128 tiles)"

    # 3) unfused-MLP path (pool-only kernel + XLA MLP, used at very large C).
    out_u = jax.block_until_ready(
        channelwise_attention(x, w1, b1, w2, b2, fuse_mlp=False))
    assert jnp.allclose(out_u, ref, atol=1e-5, rtol=1e-5), "mismatch (unfused)"

    # 4) optional fused SE product x * gate in the write pass.
    out_s = jax.block_until_ready(
        channelwise_attention(x, w1, b1, w2, b2, hw_tile=128,
                              apply_to_input=True))
    assert jnp.allclose(out_s, x * ref, atol=1e-5, rtol=1e-5), "mismatch (fused SE)"

    # 5) bf16 input, odd batch, HW not a multiple of 128: exercises the masked
    #    reduction tail, partial broadcast stores, and native-dtype output.
    N2, H2, W2 = 3, 12, 12
    x2 = jax.random.normal(kx, (N2, C, H2, W2),
                           dtype=jnp.float32).astype(jnp.bfloat16)
    ref2 = _reference(x2, w1, b1, w2, b2)
    out2 = jax.block_until_ready(
        channelwise_attention(x2, w1, b1, w2, b2, hw_tile=128))
    assert out2.dtype == jnp.bfloat16
    assert jnp.allclose(out2.astype(jnp.float32), ref2, atol=1e-2, rtol=1e-2), \
        "mismatch (bf16 / ragged HW)"

    print("KERNEL_OK")
</pallas_src>

<mosaic_0001>
module attributes {stable_mosaic.version = 11 : i64} {
  func.func @_pool_mlp_kernel(%arg0: i32, %arg1: i32, %arg2: memref<1x4x256xf32, #tpu.memory_space<vmem>>, %arg3: memref<4x1xf32, #tpu.memory_space<vmem>>, %arg4: memref<1x1xf32, #tpu.memory_space<vmem>>, %arg5: memref<1x4xf32, #tpu.memory_space<vmem>>, %arg6: memref<1x4xf32, #tpu.memory_space<vmem>>, %arg7: memref<1x1x4xf32, #tpu.memory_space<vmem>>, %arg8: memref<1x4xf32, #tpu.memory_space<vmem>>) attributes {dimension_semantics = [#tpu.dimension_semantics<parallel>, #tpu.dimension_semantics<arbitrary>], iteration_bounds = array<i64: 2, 1>, scalar_prefetch = 0 : i64, scratch_operands = 1 : i64, tpu.core_type = #tpu.core_type<tc>, window_params = [{transform_indices = @transform_0, window_bounds = array<i64: 1, 4, 256>}, {pipeline_mode = #tpu.pipeline_mode<synchronous>, transform_indices = @transform_1, window_bounds = array<i64: 4, 1>}, {pipeline_mode = #tpu.pipeline_mode<synchronous>, transform_indices = @transform_2, window_bounds = array<i64: 1, 1>}, {pipeline_mode = #tpu.pipeline_mode<synchronous>, transform_indices = @transform_3, window_bounds = array<i64: 1, 4>}, {pipeline_mode = #tpu.pipeline_mode<synchronous>, transform_indices = @transform_4, window_bounds = array<i64: 1, 4>}, {transform_indices = @transform_5, window_bounds = array<i64: 1, 1, 4>}]} {
    %c0_i32 = arith.constant 0 : i32
    %0 = arith.cmpi eq, %arg1, %c0_i32 : i32
    %1 = arith.extui %0 : i1 to i32
    %c0_i32_0 = arith.constant 0 : i32
    %2 = arith.cmpi ne, %1, %c0_i32_0 : i32
    scf.if %2 {
      %cst_9 = arith.constant 0.000000e+00 : f32
      %11 = vector.broadcast %cst_9 : f32 to vector<1x4xf32>
      %c0_10 = arith.constant 0 : index
      %c0_11 = arith.constant 0 : index
      %12 = vector.load %arg8[%c0_10, %c0_11] : memref<1x4xf32, #tpu.memory_space<vmem>>, vector<1x4xf32>
      tpu.vector_store %arg8[%c0_10, %c0_11], %11 {strides = array<i32>} : memref<1x4xf32, #tpu.memory_space<vmem>>, vector<1x4xf32>,
    } else {
    }
    %c0 = arith.constant 0 : index
    %c0_1 = arith.constant 0 : index
    %c0_2 = arith.constant 0 : index
    %3 = vector.load %arg2[%c0, %c0_1, %c0_2] : memref<1x4x256xf32, #tpu.memory_space<vmem>>, vector<1x4x256xf32>
    %c0_3 = arith.constant 0 : index
    %c0_4 = arith.constant 0 : index
    %4 = vector.load %arg8[%c0_3, %c0_4] : memref<1x4xf32, #tpu.memory_space<vmem>>, vector<1x4xf32>
    %cst = arith.constant dense<0.000000e+00> : vector<1x4xf32>
    %5 = vector.multi_reduction <add>, %3, %cst [2] : vector<1x4x256xf32> to vector<1x4xf32>
    %6 = arith.addf %4, %5 : vector<1x4xf32>
    %c0_5 = arith.constant 0 : index
    %c0_6 = arith.constant 0 : index
    %7 = vector.load %arg8[%c0_5, %c0_6] : memref<1x4xf32, #tpu.memory_space<vmem>>, vector<1x4xf32>
    tpu.vector_store %arg8[%c0_5, %c0_6], %6 {strides = array<i32>} : memref<1x4xf32, #tpu.memory_space<vmem>>, vector<1x4xf32>,
    %c0_i32_7 = arith.constant 0 : i32
    %8 = arith.cmpi eq, %arg1, %c0_i32_7 : i32
    %9 = arith.extui %8 : i1 to i32
    %c0_i32_8 = arith.constant 0 : i32
    %10 = arith.cmpi ne, %9, %c0_i32_8 : i32
    scf.if %10 {
      %c0_9 = arith.constant 0 : index
      %c0_10 = arith.constant 0 : index
      %11 = vector.load %arg8[%c0_9, %c0_10] : memref<1x4xf32, #tpu.memory_space<vmem>>, vector<1x4xf32>
      %cst_11 = arith.constant 3.906250e-03 : f32
      %12 = vector.broadcast %cst_11 : f32 to vector<1x4xf32>
      %13 = arith.mulf %11, %12 : vector<1x4xf32>
      %c0_12 = arith.constant 0 : index
      %c0_13 = arith.constant 0 : index
      %14 = vector.load %arg3[%c0_12, %c0_13] : memref<4x1xf32, #tpu.memory_space<vmem>>, vector<4x1xf32>
      %cst_14 = arith.constant dense<0.000000e+00> : vector<1x1xf32>
      %15 = tpu.matmul %13, %14, %cst_14 {dimension_numbers = #tpu.dot_dimension_numbers<[1], [0], [0], [1], [0, 0, 1, 1], [], []>} : vector<1x4xf32>, vector<4x1xf32>, vector<1x1xf32> -> vector<1x1xf32>
      %c0_15 = arith.constant 0 : index
      %c0_16 = arith.constant 0 : index
      %16 = vector.load %arg4[%c0_15, %c0_16] : memref<1x1xf32, #tpu.memory_space<vmem>>, vector<1x1xf32>
      %17 = arith.addf %15, %16 : vector<1x1xf32>
      %cst_17 = arith.constant 0.000000e+00 : f32
      %18 = vector.broadcast %cst_17 : f32 to vector<1x1xf32>
      %19 = arith.maximumf %17, %18 : vector<1x1xf32>
      %c0_18 = arith.constant 0 : index
      %c0_19 = arith.constant 0 : index
      %20 = vector.load %arg5[%c0_18, %c0_19] : memref<1x4xf32, #tpu.memory_space<vmem>>, vector<1x4xf32>
      %cst_20 = arith.constant dense<0.000000e+00> : vector<1x4xf32>
      %21 = tpu.matmul %19, %20, %cst_20 {dimension_numbers = #tpu.dot_dimension_numbers<[1], [0], [0], [1], [0, 0, 1, 1], [], []>} : vector<1x1xf32>, vector<1x4xf32>, vector<1x4xf32> -> vector<1x4xf32>
      %c0_21 = arith.constant 0 : index
      %c0_22 = arith.constant 0 : index
      %22 = vector.load %arg6[%c0_21, %c0_22] : memref<1x4xf32, #tpu.memory_space<vmem>>, vector<1x4xf32>
      %23 = arith.addf %21, %22 : vector<1x4xf32>
      %24 = arith.negf %23 : vector<1x4xf32>
      %25 = math.exp %24 : vector<1x4xf32>
      %cst_23 = arith.constant 1.000000e+00 : f32
      %26 = vector.broadcast %cst_23 : f32 to vector<1x4xf32>
      %27 = arith.addf %26, %25 : vector<1x4xf32>
      %28 = arith.divf %26, %27 : vector<1x4xf32>
      %29 = vector.shape_cast %28 : vector<1x4xf32> to vector<1x1x4xf32>
      %c0_24 = arith.constant 0 : index
      %c0_25 = arith.constant 0 : index
      %c0_26 = arith.constant 0 : index
      %30 = vector.load %arg7[%c0_24, %c0_25, %c0_26] : memref<1x1x4xf32, #tpu.memory_space<vmem>>, vector<1x1x4xf32>
      tpu.vector_store %arg7[%c0_24, %c0_25, %c0_26], %29 {strides = array<i32>} : memref<1x1x4xf32, #tpu.memory_space<vmem>>, vector<1x1x4xf32>,
    } else {
    }
    return
  }
  func.func @transform_0(%arg0: i32, %arg1: i32) -> (i32, i32, i32) {
    %c0_i32 = arith.constant 0 : i32
    %c0_i32_0 = arith.constant 0 : i32
    return %arg0, %c0_i32, %arg1 : i32, i32, i32
  }
  func.func @transform_1(%arg0: i32, %arg1: i32) -> (i32, i32) {
    %c0_i32 = arith.constant 0 : i32
    %c0_i32_0 = arith.constant 0 : i32
    %c0_i32_1 = arith.constant 0 : i32
    return %c0_i32, %c0_i32_0 : i32, i32
  }
  func.func @transform_2(%arg0: i32, %arg1: i32) -> (i32, i32) {
    %c0_i32 = arith.constant 0 : i32
    %c0_i32_0 = arith.constant 0 : i32
    %c0_i32_1 = arith.constant 0 : i32
    return %c0_i32, %c0_i32_0 : i32, i32
  }
  func.func @transform_3(%arg0: i32, %arg1: i32) -> (i32, i32) {
    %c0_i32 = arith.constant 0 : i32
    %c0_i32_0 = arith.constant 0 : i32
    %c0_i32_1 = arith.constant 0 : i32
    return %c0_i32, %c0_i32_0 : i32, i32
  }
  func.func @transform_4(%arg0: i32, %arg1: i32) -> (i32, i32) {
    %c0_i32 = arith.constant 0 : i32
    %c0_i32_0 = arith.constant 0 : i32
    %c0_i32_1 = arith.constant 0 : i32
    return %c0_i32, %c0_i32_0 : i32, i32
  }
  func.func @transform_5(%arg0: i32, %arg1: i32) -> (i32, i32, i32) {
    %c0_i32 = arith.constant 0 : i32
    %c0_i32_0 = arith.constant 0 : i32
    %c0_i32_1 = arith.constant 0 : i32
    return %arg0, %c0_i32, %c0_i32_0 : i32, i32, i32
  }
}

</mosaic_0001>

<bundles_post_ra>
// kernel: tpu_custom_call.1
= control target key start
LH: loop header
LB: loop body
LE: loop exit
PB: predicated region body
PF: predicated region fallthrough
CT: control target
= control target key end

     0   :  { %s850_s0 = inlined_call_operand.hbm [shape: f32[2,4,256], index: 0, kind: input, shape index: {}]   ;;  %s851_s1 = inlined_call_operand.vmem [shape: f32[4,1], index: 1, kind: input, shape index: {}]   ;;  %s852_s2 = inlined_call_operand.<no memory space> [shape: f32[1,1], index: 2, kind: input, shape index: {}]   ;;  %s853_s3 = inlined_call_operand.vmem [shape: f32[1,4], index: 3, kind: input, shape index: {}]   ;;  %s854_s4 = inlined_call_operand.vmem [shape: f32[1,4], index: 4, kind: input, shape index: {}]   ;;  %s855_s5 = inlined_call_operand.hbm [shape: f32[2,1,4], index: 5, kind: output, shape index: {}]  }
   0x1   :  { %v10_v0 = vstv %s852_s2 }
   0x2   :  { %11 = vst [vmem:[#allocation3] sm:$0x1] %v10_v0 }
   0x3   :  { %12 = vsyncpa [#allocation5], 0 }
   0x4   :  { %14 = vsyncpa [#allocation5 + $0x1], 0 }
   0x5   :  { %15 = vsyncpa [#allocation6], 0 }
   0x6   :  { %17 = vsyncpa [#allocation6 + $0x1], 0  ;;  %s714_s20 = smov 0   ;;  %s716_s21 = smov 0  }
   0x7   :  { %s718_s22 = smov 0   ;;  %s720_s23 = smov 0  }
   0x8   :  { %s722_s24 = smov 0   ;;  %s724_s25 = smov 0  }
   0x9 LB: > { %s479_s2 = sadd.s32 4294967295, %s677_s25   ;;  %s480_s26 = sadd.s32 4294967294, %s677_s25   ;;  %s677_s25 = sphi %s724_s25, %s23_s25   ;;  %s673_s24 = sphi %s722_s24, %s864_s24   ;;  %s669_s23 = sphi %s720_s23, %s863_s23   ;;  %s665_s22 = sphi %s718_s22, %s862_s22   ;;  %s661_s21 = sphi %s716_s21, %s861_s21   ;;  %s657_s20 = sphi %s714_s20, %s860_s20  }
   0xa   : > { %s35_s27 = sadd.s32 1, %s673_s24  ;;  %s44_s28 = sadd.s32 1, %s665_s22 }
   0xb   : > { %p37_p0 = scmp.ge.s32.totalorder %s35_s27, 2  ;;  %p51_p1 = scmp.ne.s32.totalorder %s665_s22, %s661_s21 }
   0xc   : > { %p52_p2 = scmp.eq.s32.totalorder %s677_s25, 0  ;;  %p57_p3 = scmp.ne.s32.totalorder %s661_s21, %s657_s20 }
   0xd   : > { %s866_s27 = smov (%p37_p0, %s35_s27), 0  ;;  %p58_p5 = scmp.eq.s32.totalorder %s479_s2, 0 }
   0xe   : > { %p755_p4 = por %p52_p2, %p51_p1  ;;  %s39_s30 = ssub.s32 %s673_s24, %s866_s27 }
   0xf   : > { %p165_p6 = scmp.eq.s32.totalorder %s479_s2, 1  ;;  %p42_p7 = scmp.eq.s32.totalorder %s39_s30, 0 }
  0x10   : > { %p761_p8 = por %p58_p5, %p57_p3  ;;  %p171_p10 = scmp.eq.s32.totalorder %s480_s26, 1 }
  0x11   : > { %p765_p9 = por %p165_p6, %p51_p1  ;;  %p482_p12 = scmp.ge.s32.totalorder %s677_s25, 2 }
  0x12   : > { %s770_s8 = scalar_select %p42_p7, %s665_s22, %s44_s28  }
  0x13   : > { %p772_p11 = por %p171_p10, %p57_p3  ;;  %p508_p13 = scmp.lt.s32.totalorder %s677_s25, 2 }
  0x14   : > { %s203_s10 = sand.u32 1, %s665_s22   ;;  %s495_s12 = sshll.u32 %s673_s24, 3 }
  0x15   : > { %s483_s11 = sshll.u32 %s203_s10, 3  ;;  %s214_s15 = scalar_lea.hbm %s850_s0, %s495_s12 }
  0x16   : > { %s207_s16 = scalar_lea.vmem [#allocation4], %s483_s11  ;;  %s216_s18 = sshll.u32 %s214_s15, 4  ;;  %s217_s18 = int_to_ptr.hbm [resolvable:$true] %s216_s18 }
  0x17   : > { %s218_s17 = sshll.u32 %s207_s16, 4  ;;  %p501_p0 = pnand %p508_p13, %p755_p4  ;;  %s219_s17 = int_to_ptr.vmem [resolvable:$true] %s218_s17 }
  0x18   : > { %p486_p1 = scmp.ge.s32.totalorder %s677_s25, 1  ;;  %p223_p2 = scmp.lt.s32.totalorder %s677_s25, 3 }
  0x19   : > { %s204_s19 = scalar_lea.sflag [#allocation5], %s203_s10 }
  0x1a   : > { %503 = dma.hbm_to_vmem [thread:$0]  (!%p501_p0), %s217_s18, 128, %s219_s17, %s204_s19  }
  0x1b   : > { %p224_p3 = pnand %p486_p1, %p223_p2 }
  0x1c   : > { %s788_s2 = sand.u32 (!%p224_p3), 1, %s661_s21  }
  0x1d   : > { %227 = sbr.rel (%p224_p3) target bundleno = 594 (0x252), region = 40  ;;  %s487_s26 = sshll.u32 (!%p224_p3), %s788_s2, 3 }
  0x1e   : > { %s230_s28 = scalar_lea.sflag (!%p224_p3), [#allocation5], %s788_s2  ;;  %s233_s30 = scalar_lea.vmem (!%p224_p3), [#allocation4], %s487_s26 }
  0x22   : > { %648 = dma.done.wait (%p761_p8), %s230_s28, 128  }
  0x23   : > { %650 = vsyncadd (%p761_p8), %s230_s28, 4294967168  ;;  %v267_v1 = vld [vmem:[%s233_s30] sm:$0xff]  ;;  %vm275_vm0 = vcmask 1043456   ;;  %v679_v7 = vmov 0   ;;  %vm265_vm1 = vcmask 24576   ;;  %v680_v8 = vmov 0.0   ;;  %s398_s16 = scalar_lea.hbm %s855_s5, %s669_s23 }
  0x24   : > { %270 = vst [vmem:[#allocation1] ss:$2 sm:$0xff] %v267_v1  ;;  %560 = vset.pattern.permute.xlu0 %v679_v7  ;;  %v309_v15 = vld [vmem:[%s851_s1] sm:$0xf]  ;;  %v297_v16 = vlaneseq  ;;  %vm311_vm2 = vcmask 31744   ;;  %vm345_vm3 = vcmask 1040384  }
  0x25   : > { %266 = vst.msk [vmem:[#allocation2] sm:$0x1] %vm265_vm1, %v680_v8  ;;  %488 = vmatpush.msk.msra.mxu0 %vm275_vm0, %v309_v15  ;;  %v339_v24 = vld [vmem:[%s853_s3] sm:$0x1]  ;;  %v310_v25 = vld [vmem:[#allocation3] sm:$0x1] }
  0x26   : > { %v298_v17 = vand.u32 127, %v297_v16  ;;  %490 = vmatpush.msk.msra.mxu1 %vm345_vm3, %v339_v24  ;;  %vm341_vm4 = vcmask 7168   ;;  %v340_v29 = vld [vmem:[%s854_s4] sm:$0x1]  ;;  %s259_s17 = scalar_lea.vmem [#allocation7], %s788_s2  ;;  %s402_s19 = sshll.u32 %s398_s16, 4  ;;  %s403_s19 = int_to_ptr.hbm [resolvable:$true] %s402_s19 }
  0x27   : > { %s400_s18 = sshll.u32 %s259_s17, 4  ;;  %s390_s23 = scalar_lea.sflag [#allocation6], %s788_s2  ;;  %s401_s18 = int_to_ptr.vmem [resolvable:$true] %s400_s18 }
  0x28   : > { %s609_s26 = sshra.s32 %s403_s19, 4  ;;  %s615_s6 = scalar_lea.hbm %s855_s5, 2  ;;  %s610_s26 = int_to_ptr.hbm [resolvable:$true] %s609_s26 }
  0x29   : > { %s611_s28 = scalar_lea.hbm %s610_s26, 1  ;;  %p616_p7 = scmp.lt.s32.totalorder %s610_s26, %s855_s5 }
  0x2a   : > { %p612_p4 = scmp.ne.s32.totalorder %s610_s26, %s611_s28  ;;  %p617_p8 = scmp.lt.s32.totalorder %s615_s6, %s611_s28 }
  0x2b   : > { %v271_v2 = vld.sshfl [vmem:[#allocation1] sm:$0xff pattern:$0x75316420]  ;;  %v272_v3 = vld.sshfl [vmem:[#allocation1 + $0x8] sm:$0xff pattern:$0x75316420] }
  0x2c   : > { %v276_v4 = vsel %vm275_vm0, %v271_v2, 0.0  ;;  %v277_v5 = vsel %vm275_vm0, %v272_v3, 0.0  ;;  %v268_v19 = vld [vmem:[#allocation2] sm:$0x1]  ;;  %p613_p5 = pnand %p612_p4, %p765_p9  ;;  %p618_p10 = por %p617_p8, %p616_p7 }
  0x2d   : > { %v278_v6 = vadd.f32 %v277_v5, %v276_v4 }
  0x2e   : > { %p614_p6 = pneg %p613_p5 }
  0x2f   : > { %279 = vadd.xlane.f32.xlu0 %v278_v6 }
  0x30   : > { %p619_p13 = pnand %p618_p10, %p614_p6 }
  0xa2   : > { %v280_v9 = vpop.xlane.xlu0 %279 }
  0xa3   : > { %v282_v10 = vperm.slane %v280_v9, 0  ;;  %v283_v11 = vperm.slane %v280_v9, 1  ;;  %v284_v12 = vperm.slane %v280_v9, 2  ;;  %v285_v13 = vperm.slane %v280_v9, 3 }
  0xa5   : > { %286 = vst [vmem:[#allocation1] ss:$9 sm:$0xff] %v282_v10 }
  0xa6   : > { %288 = vst [vmem:[#allocation1 + $0x1] ss:$9 sm:$0xff] %v283_v11 }
  0xa7   : > { %290 = vst [vmem:[#allocation1 + $0x2] ss:$9 sm:$0xff] %v284_v12 }
  0xa8   : > { %292 = vst [vmem:[#allocation1 + $0x3] ss:$9 sm:$0xff] %v285_v13 }
  0xaf   : > { %v293_v14 = vld [vmem:[#allocation1] sm:$0xff] }
  0xb0   : > { %295 = vperm.xlu0 %560, %v293_v14  }
 0x122   : > { %v296_v18 = vpop.permute.xlu0 %295 }
 0x123   : > { %v299_v20 = vperm.slane %v296_v18, %v298_v17 }
 0x125   : > { %v301_v21 = vadd.f32 %v299_v20, %v268_v19 }
 0x127   : > { %303 = vst.msk [vmem:[#allocation2] sm:$0x1] %vm265_vm1, %v301_v21 }
 0x12e   : > { %v307_v22 = vld [vmem:[#allocation2] sm:$0x1] }
 0x12f   : > { %v308_v23 = vmul.f32 0.00390625, %v307_v22 }
 0x131   : > { %489 = vmatmul.msk.f32.vlgmr.msra.gmra.mxu0 %vm311_vm2, %v308_v23 }
 0x1ae   : > { %v335_v26 = vpop.f32.mrf.mxu0 }
 0x1af   : > { %v336_v27 = vadd.f32 %v335_v26, %v310_v25 }
 0x1b1   : > { %v338_v28 = vmax.f32 %v336_v27, 0.0 }
 0x1b3   : > { %491 = vmatmul.msk.f32.vlgmr.msra.gmra.mxu1 %vm341_vm4, %v338_v28 }
 0x230   : > { %v366_v30 = vpop.f32.mrf.mxu1 }
 0x231   : > { %v367_v31 = vadd.f32 %v366_v30, %v340_v29 }
 0x233   : > { %v492_v32 = vmul.f32 -1.442695, %v367_v31 }
 0x235   : > { %561 = vpow2.f32 %v492_v32 }
 0x23b   : > { %v562_v33 = vpop.eup %561 }
 0x23c   : > { %v372_v34 = vadd.f32 1.0, %v562_v33 }
 0x23e   : > { %563 = vrcp.f32 %v372_v34  ;;  %v384_v38 = vand.u32 2147483648, %v372_v34  ;;  %v382_v40 = vand.u32 2147483647, %v372_v34  ;;  %vm378_vm6 = vweird.f32 %v372_v34 }
 0x240   : > { %v385_v42 = vor.u32 1.1754944e-38, %v384_v38  ;;  %vm383_vm8 = vcmp.eq.f32.partialorder %v382_v40, 8.507059e+37 }
 0x244   : > { %v564_v35 = vpop.eup %563 }
 0x245   : > { %v374_v36 = vmul.f32 %v564_v35, %v372_v34  ;;  %vm379_vm5 = vweird.f32 %v564_v35 }
 0x246   : > { %vm380_vm7 = vmor %vm378_vm6, %vm379_vm5 }
 0x247   : > { %v375_v37 = vsub.f32 1.0, %v374_v36 }
 0x249   : > { %v376_v39 = vmul.f32 %v564_v35, %v375_v37 }
 0x24b   : > { %v377_v41 = vadd.f32 %v564_v35, %v376_v39 }
 0x24d   : > { %v381_v43 = vsel %vm380_vm7, %v564_v35, %v377_v41 }
 0x24e   : > { %v386_v44 = vsel %vm383_vm8, %v385_v42, %v381_v43 }
 0x24f   : > { %388 = vst.msk [vmem:[%s259_s17] sm:$0x1] %vm265_vm1, %v386_v44 }
 0x250   : > { %622 = shalt.err (!%p619_p13)
}
 0x251   : > { %498 = dma.vmem_to_hbm [thread:$0]  (%p765_p9), %s401_s18, 16, %s403_s19, %s390_s23  }
 0x252 PF: > { %s414_s2 = sand.u32 1, %s657_s20   ;;  %p505_p0 = pnand %p482_p12, %p772_p11 }
 0x253   : > { %s415_s12 = scalar_lea.sflag [#allocation6], %s414_s2 }
 0x254   : > { %p506_p1 = pneg %p505_p0 }
 0x256   : > { %652 = dma.done.wait (%p506_p1), %s415_s12, 16  }
 0x257   : > { %654 = vsyncadd (%p506_p1), %s415_s12, 4294967280  ;;  %s23_s25 = sadd.s32 1, %s677_s25   ;;  %s860_s20 = smov %s661_s21 }
 0x258   : > { %p20_p2 = scmp.ge.s32.totalorder %s23_s25, 4   ;;  %s861_s21 = smov %s665_s22 }
 0x259   : > { %s862_s22 = smov %s770_s8  ;;  %s863_s23 = smov %s673_s24 }
 0x25a   : > { %s864_s24 = smov %s866_s27  ;;  %22 = sbr.rel (!%p20_p2) target bundleno = 9 (0x9), region = 96 }
 0x25f   :  { %420 = vsyncpa [#allocation5], 1 }
 0x260   :  { %422 = vsyncpa [#allocation5 + $0x1], 1 }
 0x261   :  { %423 = vsyncpa [#allocation6], 1 }
 0x262   :  { %425 = vsyncpa [#allocation6 + $0x1], 1 }

</bundles_post_ra>
